<compile_context>
chip_gen: v6e
topology: v6e:2x2x1
jax: 0.10.0
libtpu: 0.0.40
codegen_flags: <defaults>
</compile_context>

<pallas_src>
import jax
import jax.numpy as jnp
import numpy as np
from jax.experimental import pallas as pl
from jax.experimental.pallas import tpu as pltpu

_LANE = 1024                       # preferred row width (elems) when total divides evenly
_CHUNK_BYTES = 8 * 1024 * 1024     # ~8 MiB per DMA chunk
_NSEM = 4                          # full-size DMAs in flight


def _make_copy_kernel(n_full, chunk_rows, tail_rows, nsem):
    """Build a chunked HBM->HBM memcpy kernel (all sizes are trace-time ints)."""

    def kernel(x_hbm, o_hbm, sems):
        def cp(start, size, slot):
            return pltpu.make_async_copy(
                x_hbm.at[pl.ds(start, size)],
                o_hbm.at[pl.ds(start, size)],
                sems.at[slot],
            )

        # Kick off the ragged tail first on its own semaphore so it overlaps
        # with the full-size chunks.
        if tail_rows:
            cp(n_full * chunk_rows, tail_rows, nsem).start()

        if n_full:
            # Prime up to `nsem` full-size DMAs.
            for i in range(min(nsem, n_full)):
                cp(i * chunk_rows, chunk_rows, i).start()

            # Wait chunk i; as soon as its semaphore slot frees, launch chunk
            # i + nsem on the same slot (rotating double/quad buffering of
            # in-flight DMA descriptors, no VMEM involved).
            @pl.loop(0, n_full)
            def _(i):
                slot = i % nsem
                cp(pl.multiple_of(i * chunk_rows, chunk_rows),
                   chunk_rows, slot).wait()
                j = i + nsem

                @pl.when(j < n_full)
                def _():
                    cp(pl.multiple_of(j * chunk_rows, chunk_rows),
                       chunk_rows, slot).start()

        if tail_rows:
            cp(n_full * chunk_rows, tail_rows, nsem).wait()

    return kernel


def rev_container_forward(x):
    """Identity pass-through of the (abstract) RevContainer as a Pallas kernel.

    x: any-shaped array (canonically NCHW). Returns an array with identical
    shape / dtype / values.
    """
    orig_shape = x.shape
    dtype = x.dtype

    total = 1
    for d in orig_shape:
        total *= d

    # Degenerate cases: nothing to copy / rank-0 scalar -> identity, no launch.
    if total == 0 or x.ndim == 0:
        return x

    itemsize = jnp.dtype(dtype).itemsize

    # Present the data as rows sliced only along the leading axis:
    #   * lane-multiple sizes -> (rows, 1024) slabs (nicely aligned DMAs)
    #   * anything else       -> flat 1-D, 1-element rows (no padding, ever)
    # Both reshapes are metadata-only for a contiguous input (no HBM pass).
    if total % _LANE == 0:
        flat = x.reshape(total // _LANE, _LANE)
        row_elems = _LANE
    else:
        flat = x.reshape(total)
        row_elems = 1
    n_rows = total // row_elems

    row_bytes = row_elems * itemsize
    chunk_rows = max(1, _CHUNK_BYTES // row_bytes)
    chunk_rows = min(chunk_rows, n_rows)
    n_full = n_rows // chunk_rows
    tail_rows = n_rows - n_full * chunk_rows

    out_flat = pl.pallas_call(
        _make_copy_kernel(n_full, chunk_rows, tail_rows, _NSEM),
        out_shape=jax.ShapeDtypeStruct(flat.shape, dtype),
        in_specs=[pl.BlockSpec(memory_space=pl.ANY)],
        out_specs=pl.BlockSpec(memory_space=pl.ANY),
        scratch_shapes=[pltpu.SemaphoreType.DMA((_NSEM + 1,))],
        cost_estimate=pl.CostEstimate(
            flops=0,
            transcendentals=0,
            bytes_accessed=2 * total * itemsize,
        ),
    )(flat)

    return out_flat.reshape(orig_shape)


if __name__ == "__main__":
    key = jax.random.PRNGKey(0)
    # Small NCHW input consistent with a container wrapping conv-style blocks.
    x = jax.random.normal(key, (2, 4, 16, 16), dtype=jnp.float32)

    # Host-side reference copy (robust against any buffer reuse).
    x_host = np.asarray(jax.device_get(x))

    y = rev_container_forward(x)
    y = jax.block_until_ready(y)

    assert y.shape == x_host.shape
    assert y.dtype == x_host.dtype
    assert np.array_equal(np.asarray(jax.device_get(y)), x_host)

    print("KERNEL_OK")
</pallas_src>

<mosaic_0001>
module attributes {stable_mosaic.version = 11 : i64} {
  func.func @kernel(%arg0: memref<2x1024xf32, #tpu.memory_space<any>>, %arg1: memref<2x1024xf32, #tpu.memory_space<any>>, %arg2: memref<5x!tpu.dma_semaphore, #tpu.memory_space<semaphore_mem>>) attributes {dimension_semantics = [], scalar_prefetch = 0 : i64, scratch_operands = 1 : i64, tpu.core_type = #tpu.core_type<tc>} {
    %c0_i32 = arith.constant 0 : i32
    %c0_i32_0 = arith.constant 0 : i32
    %c0_i32_1 = arith.constant 0 : i32
    %0 = tpu.memref_slice %arg0[%c0_i32_0, %c0_i32_1] : memref<2x1024xf32, #tpu.memory_space<any>> -> memref<2x1024xf32, #tpu.memory_space<any>>
    %c0_i32_2 = arith.constant 0 : i32
    %c0_i32_3 = arith.constant 0 : i32
    %1 = tpu.memref_slice %arg1[%c0_i32_2, %c0_i32_3] : memref<2x1024xf32, #tpu.memory_space<any>> -> memref<2x1024xf32, #tpu.memory_space<any>>
    %2 = tpu.memref_slice %arg2[%c0_i32] : memref<5x!tpu.dma_semaphore, #tpu.memory_space<semaphore_mem>> -> memref<1x!tpu.dma_semaphore, #tpu.memory_space<semaphore_mem>>
    %3 = tpu.memref_squeeze %2 : memref<1x!tpu.dma_semaphore, #tpu.memory_space<semaphore_mem>> -> memref<!tpu.dma_semaphore, #tpu.memory_space<semaphore_mem>>
    tpu.enqueue_dma source(%0 : memref<2x1024xf32, #tpu.memory_space<any>>) target(%1 : memref<2x1024xf32, #tpu.memory_space<any>>) target_semaphore(%3 : memref<!tpu.dma_semaphore, #tpu.memory_space<semaphore_mem>>)
    %c0_i32_4 = arith.constant 0 : i32
    %c1_i32 = arith.constant 1 : i32
    %4 = arith.muli %c0_i32_4, %c1_i32 : i32
    %c0_i32_5 = arith.constant 0 : i32
    %5 = arith.addi %c0_i32_5, %4 : i32
    %c4_i32 = arith.constant 4 : i32
    %c0_i32_6 = arith.constant 0 : i32
    %6 = arith.cmpi eq, %c4_i32, %c0_i32_6 : i32
    %c1_i32_7 = arith.constant 1 : i32
    %7 = arith.select %6, %c1_i32_7, %c4_i32 : i32
    %8 = arith.remsi %5, %7 : i32
    %c0_i32_8 = arith.constant 0 : i32
    %9 = arith.cmpi ne, %8, %c0_i32_8 : i32
    %c0_i32_9 = arith.constant 0 : i32
    %10 = arith.cmpi slt, %8, %c0_i32_9 : i32
    %c0_i32_10 = arith.constant 0 : i32
    %11 = arith.cmpi slt, %7, %c0_i32_10 : i32
    %12 = arith.xori %10, %11 : i1
    %13 = arith.andi %12, %9 : i1
    %14 = arith.addi %8, %7 : i32
    %15 = arith.select %13, %14, %8 : i32
    %c2_i32 = arith.constant 2 : i32
    %16 = arith.muli %5, %c2_i32 : i32
    %17 = tpu.assume_multiple %16, 2 : i32
    %c0_i32_11 = arith.constant 0 : i32
    %18 = tpu.memref_slice %arg0[%17, %c0_i32_11] : memref<2x1024xf32, #tpu.memory_space<any>> -> memref<2x1024xf32, #tpu.memory_space<any>>
    %c0_i32_12 = arith.constant 0 : i32
    %19 = tpu.memref_slice %arg1[%17, %c0_i32_12] : memref<2x1024xf32, #tpu.memory_space<any>> -> memref<2x1024xf32, #tpu.memory_space<any>>
    %20 = tpu.memref_slice %arg2[%15] : memref<5x!tpu.dma_semaphore, #tpu.memory_space<semaphore_mem>> -> memref<1x!tpu.dma_semaphore, #tpu.memory_space<semaphore_mem>>
    %21 = tpu.memref_squeeze %20 : memref<1x!tpu.dma_semaphore, #tpu.memory_space<semaphore_mem>> -> memref<!tpu.dma_semaphore, #tpu.memory_space<semaphore_mem>>
    tpu.wait_dma2 semaphore(%21 : memref<!tpu.dma_semaphore, #tpu.memory_space<semaphore_mem>>) src(%18 : memref<2x1024xf32, #tpu.memory_space<any>>) dst(%19 : memref<2x1024xf32, #tpu.memory_space<any>>)
    %c4_i32_13 = arith.constant 4 : i32
    %22 = arith.addi %5, %c4_i32_13 : i32
    %c1_i32_14 = arith.constant 1 : i32
    %23 = arith.cmpi slt, %22, %c1_i32_14 : i32
    %24 = arith.extui %23 : i1 to i32
    %c0_i32_15 = arith.constant 0 : i32
    %25 = arith.cmpi ne, %24, %c0_i32_15 : i32
    scf.if %25 {
      %c2_i32_17 = arith.constant 2 : i32
      %26 = arith.muli %22, %c2_i32_17 : i32
      %27 = tpu.assume_multiple %26, 2 : i32
      %c0_i32_18 = arith.constant 0 : i32
      %28 = tpu.memref_slice %arg0[%27, %c0_i32_18] : memref<2x1024xf32, #tpu.memory_space<any>> -> memref<2x1024xf32, #tpu.memory_space<any>>
      %c0_i32_19 = arith.constant 0 : i32
      %29 = tpu.memref_slice %arg1[%27, %c0_i32_19] : memref<2x1024xf32, #tpu.memory_space<any>> -> memref<2x1024xf32, #tpu.memory_space<any>>
      %30 = tpu.memref_slice %arg2[%15] : memref<5x!tpu.dma_semaphore, #tpu.memory_space<semaphore_mem>> -> memref<1x!tpu.dma_semaphore, #tpu.memory_space<semaphore_mem>>
      %31 = tpu.memref_squeeze %30 : memref<1x!tpu.dma_semaphore, #tpu.memory_space<semaphore_mem>> -> memref<!tpu.dma_semaphore, #tpu.memory_space<semaphore_mem>>
      tpu.enqueue_dma source(%28 : memref<2x1024xf32, #tpu.memory_space<any>>) target(%29 : memref<2x1024xf32, #tpu.memory_space<any>>) target_semaphore(%31 : memref<!tpu.dma_semaphore, #tpu.memory_space<semaphore_mem>>)
    } else {
    }
    %c1_i32_16 = arith.constant 1 : i32
    return
  }
}

</mosaic_0001>

<bundles_post_ra>
// kernel: tpu_custom_call.1
= control target key start
LH: loop header
LB: loop body
LE: loop exit
PB: predicated region body
PF: predicated region fallthrough
CT: control target
= control target key end

     0   :  { %s61_s6 = smov [#allocation2]   ;;  %s62_s7 = smov 131072   ;;  %s80_s0 = inlined_call_operand.hbm [shape: f32[2,1024], index: 0, kind: input, shape index: {}]   ;;  %s81_s1 = inlined_call_operand.hbm [shape: f32[2,1024], index: 1, kind: output, shape index: {}]  }
   0x1   :  { %s63_s8 = smov 0  }
   0x2   :  { %12 = dma.general %s80_s0, 256, %s81_s1, %s61_s6, %s62_s7, [#allocation4], %s63_s8, 0  }
   0x3   :  { %59 = dma.done.wait [#allocation2], 256 }
   0x4   :  { %60 = vsyncadd [#allocation2], 4294967040 }
   0x5   :  { %17 = vsyncmov [#allocation2] }
   0x8   :  { %s18_s13 = vpop.sfrf %17 }
   0x9   :  { %p51_p0 = scmp.ne.s32.totalorder %s18_s13, 0 }
   0xb   :  { %22 = shalt.err (%p51_p0)  }
   0xc   :  { %24 = vsyncmov [#allocation2 + $0x1] }
   0xf   :  { %s25_s14 = vpop.sfrf %24 }
  0x10   :  { %p52_p1 = scmp.ne.s32.totalorder %s25_s14, 0 }
  0x12   :  { %29 = shalt.err (%p52_p1)  }
  0x13   :  { %31 = vsyncmov [#allocation2 + $0x2] }
  0x16   :  { %s32_s15 = vpop.sfrf %31 }
  0x17   :  { %p53_p2 = scmp.ne.s32.totalorder %s32_s15, 0 }
  0x19   :  { %36 = shalt.err (%p53_p2)  }
  0x1a   :  { %38 = vsyncmov [#allocation2 + $0x3] }
  0x1d   :  { %s39_s16 = vpop.sfrf %38 }
  0x1e   :  { %p54_p3 = scmp.ne.s32.totalorder %s39_s16, 0 }
  0x20   :  { %43 = shalt.err (%p54_p3)  }
  0x21   :  { %45 = vsyncmov [#allocation2 + $0x4] }
  0x24   :  { %s46_s0 = vpop.sfrf %45 }
  0x25   :  { %p55_p4 = scmp.ne.s32.totalorder %s46_s0, 0 }
  0x27   :  { %50 = shalt.err (%p55_p4)  }

</bundles_post_ra>
